<compile_context>
chip_gen: v7x
topology: tpu7x:2x2x1
jax: 0.10.0
libtpu: 0.0.40
codegen_flags: <defaults>
</compile_context>

<pallas_src>
import math
import functools

import jax
import jax.numpy as jnp
from jax import lax
from jax.experimental import pallas as pl
from jax.experimental.pallas import tpu as pltpu


# ---------------------------------------------------------------------------
# Parameter setup (plain JAX "glue"): the sinusoidal PE buffer, same math as
# the PyTorch module.
# ---------------------------------------------------------------------------
def make_pe_table(max_seq: int, model_dim: int, dtype=jnp.float32) -> jax.Array:
    position = jnp.arange(max_seq, dtype=jnp.float32)[:, None]                 # (max_seq, 1)
    div_term = jnp.exp(
        jnp.arange(0, model_dim, 2, dtype=jnp.float32) * (-(math.log(10000.0) / model_dim))
    )                                                                          # (model_dim//2,)
    angles = position * div_term                                               # (max_seq, model_dim//2)
    pe = jnp.zeros((max_seq, model_dim), jnp.float32)
    pe = pe.at[:, 0::2].set(jnp.sin(angles))
    pe = pe.at[:, 1::2].set(jnp.cos(angles))
    return pe.astype(dtype)


# ---------------------------------------------------------------------------
# Kernels
# ---------------------------------------------------------------------------
def add_pe_kernel(x_ref, pe_ref, o_ref):
    # x_ref/o_ref: one tile of the (rows, cols) view of the embeddings.
    # pe_ref: matching PE tile (either same shape, or (1, cols) broadcast).
    o_ref[...] = x_ref[...] + pe_ref[...]


def add_pe_dropout_kernel(seed_ref, x_ref, pe_ref, o_ref, *, p: float, total_cols: int):
    # Fused PE-add + inverted dropout.  The keep/drop decision is a pure
    # function of (seed, global element index) via a counter-based integer
    # hash -> works on TPU and in interpret mode, and is tiling-invariant.
    # TODO(synk): this does not reproduce torch's RNG stream bit-for-bit; it
    # implements the same Bernoulli(1-p) mask + 1/(1-p) scaling semantics.
    y = x_ref[...] + pe_ref[...]
    tr, tc = x_ref.shape                                 # static tile shape
    i = pl.program_id(0)
    j = pl.program_id(1)

    row = lax.broadcasted_iota(jnp.int32, (tr, tc), 0).astype(jnp.uint32)
    col = lax.broadcasted_iota(jnp.int32, (tr, tc), 1).astype(jnp.uint32)
    g_row = (i * tr).astype(jnp.uint32) + row
    g_col = (j * tc).astype(jnp.uint32) + col
    idx = g_row * jnp.uint32(total_cols) + g_col         # global flat element index

    # lowbias32 hash, mixed with the seed (wrapping uint32 arithmetic).
    seed_u = seed_ref[0].astype(jnp.uint32)
    h = idx + seed_u * jnp.uint32(0x9E3779B1)
    h = h ^ lax.shift_right_logical(h, jnp.uint32(16))
    h = h * jnp.uint32(0x7FEB352D)
    h = h ^ lax.shift_right_logical(h, jnp.uint32(15))
    h = h * jnp.uint32(0x846CA68B)
    h = h ^ lax.shift_right_logical(h, jnp.uint32(16))

    # Integer-threshold keep decision in 31 bits (avoids unsigned compare and
    # any float-uniform construction): keep prob = 1 - p.
    r31 = lax.shift_right_logical(h, jnp.uint32(1)).astype(jnp.int32)
    thr = jnp.int32(min(int(p * (1 << 31)), (1 << 31) - 1))
    keep = r31 >= thr

    scale = jnp.asarray(1.0 / (1.0 - p), y.dtype)        # pre-folded constant
    o_ref[...] = jnp.where(keep, y * scale, jnp.zeros_like(y))


# ---------------------------------------------------------------------------
# Wrapper
# ---------------------------------------------------------------------------
def _largest_divisor(n: int, *, step: int, cap: int) -> int:
    """Largest multiple of `step` that divides n and is <= cap (assumes step | n)."""
    best = step
    d = step
    cap = max(cap, step)
    limit = min(n, cap)
    while d <= limit:
        if n % d == 0:
            best = d
        d += step
    return best


def position_embedding(x: jax.Array, pe: jax.Array, *, p: float = 0.0,
                       training: bool = False, seed: int = 0,
                       donate_input: bool = False) -> jax.Array:
    """x: (B, S, D) embeddings; pe: (max_seq, D) sinusoidal table."""
    B, S, D = x.shape
    dtype = x.dtype
    itemsize = jnp.dtype(dtype).itemsize
    pe_slice = pe[:S].astype(dtype)                      # (S, D), single cast point

    target_tile_bytes = 2 << 20                          # ~2 MiB per tile (VMEM-friendly on v7x)

    if D % 128 == 0 and S % 8 == 0:
        # Path A: lane-dense already.  Flatten batch into rows, tile the rows.
        cap_rows = max(8, target_tile_bytes // (D * itemsize))
        tr = _largest_divisor(S, step=8, cap=cap_rows)   # tr | S -> PE period works
        view = x.reshape(B * S, D)
        pe_view = pe_slice                               # (S, D)
        grid = (B * S // tr, 1)
        x_block, pe_block = (tr, D), (tr, D)
        n_pe_blocks = S // tr
        total_cols = D
        x_index = lambda i, j, *_: (i, j)
    elif (S * D) % 128 == 0:
        # Path B: fold seq*feature into the lane axis for unmasked stores.
        C = S * D
        cap_cols = max(128, target_tile_bytes // max(1, B * itemsize))
        tc = _largest_divisor(C, step=128, cap=cap_cols)
        view = x.reshape(B, C)
        pe_view = pe_slice.reshape(1, C)
        grid = (1, C // tc)
        x_block, pe_block = (B, tc), (1, tc)
        n_pe_blocks = 1
        total_cols = C
        x_index = lambda i, j, *_: (i, j)
    else:
        # Path C: awkward shapes — whole (S, D) per batch element (block equals
        # full dims, so always layout-legal; correct but masked stores).
        view = x
        pe_view = pe_slice
        grid = (B, 1)
        x_block, pe_block = (None, S, D), (S, D)
        n_pe_blocks = 1
        total_cols = D
        x_index = lambda i, j, *_: (i, 0, 0)

    pe_index = lambda i, j, *_: (i % n_pe_blocks, j)

    x_spec = pl.BlockSpec(x_block, x_index)
    pe_spec = pl.BlockSpec(pe_block, pe_index)
    out_spec = pl.BlockSpec(x_block, x_index)
    out_shape = jax.ShapeDtypeStruct(view.shape, dtype)

    cost = pl.CostEstimate(
        flops=4 * B * S * D,
        transcendentals=0,
        bytes_accessed=2 * B * S * D * itemsize + S * D * itemsize,
    )
    cparams = pltpu.CompilerParams(
        dimension_semantics=("parallel", "parallel"),
        vmem_limit_bytes=32 << 20,
    )

    if (not training) or p <= 0.0:
        out = pl.pallas_call(
            add_pe_kernel,
            out_shape=out_shape,
            grid_spec=pltpu.PrefetchScalarGridSpec(
                num_scalar_prefetch=0,
                grid=grid,
                in_specs=[x_spec, pe_spec],
                out_specs=out_spec,
            ),
            compiler_params=cparams,
            cost_estimate=cost,
            input_output_aliases=({0: 0} if donate_input else {}),
        )(view, pe_view)
        return out.reshape(B, S, D)

    if p >= 1.0:                                          # torch drops everything at p=1
        return jnp.zeros_like(x)

    seed_arr = jnp.asarray([seed], jnp.int32)
    kernel = functools.partial(add_pe_dropout_kernel, p=float(p), total_cols=total_cols)
    out = pl.pallas_call(
        kernel,
        out_shape=out_shape,
        grid_spec=pltpu.PrefetchScalarGridSpec(
            num_scalar_prefetch=1,                        # seed -> SMEM
            grid=grid,
            in_specs=[x_spec, pe_spec],
            out_specs=out_spec,
        ),
        compiler_params=cparams,
        cost_estimate=cost,
        input_output_aliases=({1: 0} if donate_input else {}),
    )(seed_arr, view, pe_view)
    return out.reshape(B, S, D)


# ---------------------------------------------------------------------------
# Demo / self-check
# ---------------------------------------------------------------------------
if __name__ == "__main__":
    B, S, D = 2, 8, 32          # batch, seq_len, model_dim (matches module semantics)
    MAX_SEQ = 500
    DROPOUT_P = 0.5

    key = jax.random.PRNGKey(0)
    x = jax.random.normal(key, (B, S, D), dtype=jnp.float32)
    pe = make_pe_table(MAX_SEQ, D)
    ref = x + pe[None, :S, :]

    # Eval mode (dropout = identity): exact check against reference.
    out_eval = jax.block_until_ready(position_embedding(x, pe, p=DROPOUT_P, training=False))
    assert out_eval.shape == (B, S, D)
    assert jnp.allclose(out_eval, ref, atol=1e-6), "eval-mode mismatch vs reference"

    # Training mode: survivors must equal (x+pe)/(1-p); dropped positions are 0.
    out_train = jax.block_until_ready(
        position_embedding(x, pe, p=DROPOUT_P, training=True, seed=123))
    assert out_train.shape == (B, S, D)
    scaled = ref / (1.0 - DROPOUT_P)
    ok = jnp.logical_or(jnp.isclose(out_train, 0.0, atol=1e-6),
                        jnp.isclose(out_train, scaled, atol=1e-5, rtol=1e-5))
    assert bool(jnp.all(ok)), "training-mode dropout values inconsistent"
    kept_frac = float(jnp.mean(jnp.abs(out_train) > 1e-6))
    assert 0.1 < kept_frac < 0.9, "dropout mask degenerate"

    # Exercise the lane-dense D % 128 == 0 path.
    x128 = jax.random.normal(jax.random.PRNGKey(1), (2, 16, 128), jnp.float32)
    pe128 = make_pe_table(MAX_SEQ, 128)
    o128 = jax.block_until_ready(position_embedding(x128, pe128))
    assert jnp.allclose(o128, x128 + pe128[None, :16, :], atol=1e-6)

    # Exercise the awkward-shape fallback path.
    x_odd = jax.random.normal(jax.random.PRNGKey(2), (2, 5, 12), jnp.float32)
    pe_odd = make_pe_table(MAX_SEQ, 12)
    o_odd = jax.block_until_ready(position_embedding(x_odd, pe_odd))
    assert jnp.allclose(o_odd, x_odd + pe_odd[None, :5, :], atol=1e-6)

    print("KERNEL_OK")
</pallas_src>

<mosaic_0001>
module attributes {stable_mosaic.version = 11 : i64} {
  func.func @add_pe_kernel(%arg0: i32, %arg1: i32, %arg2: memref<2x256xf32, #tpu.memory_space<vmem>>, %arg3: memref<1x256xf32, #tpu.memory_space<vmem>>, %arg4: memref<2x256xf32, #tpu.memory_space<vmem>>) attributes {dimension_semantics = [#tpu.dimension_semantics<parallel>, #tpu.dimension_semantics<parallel>], iteration_bounds = array<i64: 1, 1>, scalar_prefetch = 0 : i64, scratch_operands = 0 : i64, tpu.core_type = #tpu.core_type<tc>, window_params = [{transform_indices = @transform_0, window_bounds = array<i64: 2, 256>}, {transform_indices = @transform_1, window_bounds = array<i64: 1, 256>}, {transform_indices = @transform_2, window_bounds = array<i64: 2, 256>}]} {
    %c0 = arith.constant 0 : index
    %c0_0 = arith.constant 0 : index
    %0 = vector.load %arg2[%c0, %c0_0] : memref<2x256xf32, #tpu.memory_space<vmem>>, vector<2x256xf32>
    %c0_1 = arith.constant 0 : index
    %c0_2 = arith.constant 0 : index
    %1 = vector.load %arg3[%c0_1, %c0_2] : memref<1x256xf32, #tpu.memory_space<vmem>>, vector<1x256xf32>
    %2 = vector.broadcast %1 : vector<1x256xf32> to vector<2x256xf32>
    %3 = arith.addf %0, %2 : vector<2x256xf32>
    %c0_3 = arith.constant 0 : index
    %c0_4 = arith.constant 0 : index
    %4 = vector.load %arg4[%c0_3, %c0_4] : memref<2x256xf32, #tpu.memory_space<vmem>>, vector<2x256xf32>
    tpu.vector_store %arg4[%c0_3, %c0_4], %3 {strides = array<i32>} : memref<2x256xf32, #tpu.memory_space<vmem>>, vector<2x256xf32>,
    return
  }
  func.func @transform_0(%arg0: i32, %arg1: i32) -> (i32, i32) {
    %c0_i32 = arith.constant 0 : i32
    return %arg0, %arg1 : i32, i32
  }
  func.func @transform_1(%arg0: i32, %arg1: i32) -> (i32, i32) {
    %c1_i32 = arith.constant 1 : i32
    %c0_i32 = arith.constant 0 : i32
    %0 = arith.cmpi eq, %c1_i32, %c0_i32 : i32
    %c1_i32_0 = arith.constant 1 : i32
    %1 = arith.select %0, %c1_i32_0, %c1_i32 : i32
    %2 = arith.remsi %arg0, %1 : i32
    %c0_i32_1 = arith.constant 0 : i32
    %3 = arith.cmpi ne, %2, %c0_i32_1 : i32
    %c0_i32_2 = arith.constant 0 : i32
    %4 = arith.cmpi slt, %2, %c0_i32_2 : i32
    %c0_i32_3 = arith.constant 0 : i32
    %5 = arith.cmpi slt, %1, %c0_i32_3 : i32
    %6 = arith.xori %4, %5 : i1
    %7 = arith.andi %6, %3 : i1
    %8 = arith.addi %2, %1 : i32
    %9 = arith.select %7, %8, %2 : i32
    %c0_i32_4 = arith.constant 0 : i32
    return %9, %arg1 : i32, i32
  }
  func.func @transform_2(%arg0: i32, %arg1: i32) -> (i32, i32) {
    %c0_i32 = arith.constant 0 : i32
    return %arg0, %arg1 : i32, i32
  }
}

</mosaic_0001>

<bundles_post_ra>
// kernel: tpu_custom_call.1
= control target key start
LH: loop header
LB: loop body
LE: loop exit
PB: predicated region body
PF: predicated region fallthrough
CT: control target
= control target key end

     0   :  { %7 = vsyncpa [#allocation3], 0  ;;  %s157_s0 = inlined_call_operand.hbm [shape: f32[2,256], index: 0, kind: input, shape index: {}]   ;;  %s158_s1 = inlined_call_operand.vmem [shape: f32[1,256], index: 1, kind: input, shape index: {}]   ;;  %s159_s2 = inlined_call_operand.hbm [shape: f32[2,256], index: 2, kind: output, shape index: {}]  }
   0x1   :  { %8 = vsyncpa [#allocation4], 0  ;;  %s112_s9 = smov [#allocation2]   ;;  %s64_s13 = scalar_lea.hbm %s157_s0, 64 }
   0x2   :  { %s15_s10 = sshll.u32 %s112_s9, 4  ;;  %p65_p0 = scmp.ne.s32.totalorder %s157_s0, %s64_s13  ;;  %s16_s10 = int_to_ptr.vmem [resolvable:$true] %s15_s10 }
   0x3   :  { %p68_p1 = scmp.lt.u32.totalorder %s64_s13, %s157_s0 }
   0x5   :  { %p70_p2 = pnand %p68_p1, %p65_p0 }
   0x7   :  { %73 = shalt.err (!%p70_p2)
}
   0x8   :  { %s74_s18 = scalar_lea.vmem %s16_s10, 64  ;;  %p79_p4 = scmp.lt.s32.totalorder %s16_s10, %s16_s10 }
   0x9   :  { %p75_p3 = scmp.ne.s32.totalorder %s16_s10, %s74_s18  ;;  %p80_p5 = scmp.lt.s32.totalorder %s74_s18, %s74_s18 }
   0xb   :  { %p81_p6 = por %p80_p5, %p79_p4 }
   0xd   :  { %p82_p7 = pnand %p81_p6, %p75_p3 }
   0xf   :  { %85 = shalt.err (!%p82_p7)
}
  0x10   :  { %18 = dma.hbm_to_vmem [thread:$0]  %s157_s0, 64, %s16_s10, [#allocation3]  }
  0x11   :  { %108 = dma.done.wait [#allocation3], 64  }
  0x12   :  { %109 = vsyncadd [#allocation3], 4294967232  ;;  %v27_v0 = vlaneseq  ;;  %v113_v1 = vmov 1983009808   ;;  %v25_v7 = vld [vmem:[%s158_s1] sm:$0x3] }
  0x13   :  { %v37_v2 = vunpack.c.l.s4 %v113_v1  ;;  %v24_v12 = vld [vmem:[#allocation2] sm:$0xf]  ;;  %s114_s23 = smov [#allocation5]  }
  0x14   :  { %v28_v3 = vshrl.u32 %v27_v0, 7  ;;  %s52_s0 = sshll.u32 %s114_s23, 4  ;;  %s53_s0 = int_to_ptr.vmem [resolvable:$true] %s52_s0 }
  0x15   :  { %v38_v6 = vunpack.c.0.s8 %v37_v2  ;;  %s86_s24 = scalar_lea.vmem %s53_s0, 64  ;;  %p91_p9 = scmp.lt.s32.totalorder %s53_s0, %s53_s0 }
  0x16   :  { %v29_v4 = vsub.s32 0, %v28_v3  ;;  %v33_v5 = vsub.s32 1, %v28_v3  ;;  %p87_p8 = scmp.ne.s32.totalorder %s53_s0, %s86_s24  ;;  %p92_p10 = scmp.lt.s32.totalorder %s86_s24, %s86_s24 }
  0x17   :  { %v41_v10 = vsub.s32 %v38_v6, %v28_v3 }
  0x18   :  { %v30_v8 = vrot.slane %v25_v7, %v29_v4  ;;  %v34_v9 = vrot.slane %v25_v7, %v33_v5  ;;  %p93_p11 = por %p92_p10, %p91_p9 }
  0x1a   :  { %v35_v11 = vcombine.low %v30_v8, %v34_v9  ;;  %p94_p12 = pnand %p93_p11, %p87_p8 }
  0x1c   :  { %v42_v13 = vrot.slane %v35_v11, %v41_v10 }
  0x1e   :  { %v44_v14 = vadd.f32 %v42_v13, %v24_v12 }
  0x20   :  { %45 = vst [vmem:[#allocation5] sm:$0xf] %v44_v14 }
  0x21   :  { %97 = shalt.err (!%p94_p12)
}
  0x22   :  { %s98_s26 = scalar_lea.hbm %s159_s2, 64 }
  0x23   :  { %p99_p13 = scmp.ne.s32.totalorder %s159_s2, %s98_s26  ;;  %p102_p0 = scmp.lt.u32.totalorder %s98_s26, %s159_s2 }
  0x25   :  { %p104_p1 = pnand %p102_p0, %p99_p13 }
  0x27   :  { %107 = shalt.err (!%p104_p1)
}
  0x28   :  { %55 = dma.vmem_to_hbm [thread:$0]  %s53_s0, 64, %s159_s2, [#allocation4]  }
  0x29   :  { %110 = dma.done.wait [#allocation4], 64  }
  0x2a   :  { %111 = vsyncadd [#allocation4], 4294967232 }
  0x2b   :  { %59 = vsyncpa [#allocation3], 1 }
  0x2c   :  { %60 = vsyncpa [#allocation4], 1 }

</bundles_post_ra>
